<compile_context>
chip_gen: v7x
topology: tpu7x:2x2x1
jax: 0.10.0
libtpu: 0.0.40
codegen_flags: <defaults>
</compile_context>

<pallas_src>
import functools
import math

import jax
import jax.numpy as jnp
from jax.experimental import pallas as pl
from jax.experimental.pallas import tpu as pltpu

_LANE = 128


def _round_up(a, b):
    return ((a + b - 1) // b) * b


def _logvar_kernel(x_ref, o_ref):
    # x_ref: (T, RB) -- reduce over sublanes (axis 0).  o_ref: (1, RB), lane-dense.
    x = x_ref[...].astype(jnp.float32)
    n = x.shape[0]
    mean = jnp.sum(x, axis=0, keepdims=True) * (1.0 / n)
    d = x - mean
    # torch.var default: unbiased (correction=1), two-pass mean subtraction.
    # TODO(synk): for T == 1 torch.var yields NaN (0/0); here it clamps to log(1e-6).
    var = jnp.sum(d * d, axis=0, keepdims=True) * (1.0 / max(n - 1, 1))
    var = jnp.clip(var, 1e-6, 1e6)
    o_ref[...] = jnp.log(var).astype(o_ref.dtype)


@functools.partial(jax.jit, static_argnames=("dim",))
def log_var_layer(x, dim):
    """Pallas equivalent of LogVarLayer(dim).forward(x)."""
    ndim = x.ndim
    dim = dim % ndim

    # Glue: reduction axis -> sublanes (front), flattened remaining axes -> lanes.
    # TODO(synk): when dim == ndim-1 this moveaxis costs one extra HBM transpose;
    # fusing it (in-kernel transpose / N-D BlockSpec walk) would remove that pass.
    x_m = jnp.moveaxis(x, dim, 0)
    T = x_m.shape[0]
    lead = x_m.shape[1:]
    rows = math.prod(lead) if lead else 1
    x2d = x_m.reshape(T, rows)

    # Lane-block sizing: ~2 MiB (f32) per input block, multiple of 128 lanes.
    target_elems = (2 * 1024 * 1024) // 4
    rb = max(_LANE, ((target_elems // max(T, 1)) // _LANE) * _LANE)
    rows_lane = _round_up(rows, _LANE)
    RB = min(rb, rows_lane)
    # Keep at least 2 grid steps when there is enough work (v7x: 2 TensorCores).
    if rows_lane >= 2 * _LANE:
        RB = min(RB, _round_up((rows_lane + 1) // 2, _LANE))

    rows_p = _round_up(rows, RB)
    if rows_p != rows:
        x2d = jnp.pad(x2d, ((0, 0), (0, rows_p - rows)))

    out2d = pl.pallas_call(
        _logvar_kernel,
        out_shape=jax.ShapeDtypeStruct((1, rows_p), x.dtype),
        grid_spec=pltpu.PrefetchScalarGridSpec(
            num_scalar_prefetch=0,
            grid=(rows_p // RB,),
            in_specs=[pl.BlockSpec((T, RB), lambda i: (0, i))],
            out_specs=pl.BlockSpec((1, RB), lambda i: (0, i)),
        ),
        compiler_params=pltpu.CompilerParams(
            dimension_semantics=("parallel",),
            vmem_limit_bytes=32 * 1024 * 1024,
        ),
    )(x2d)

    # Glue: restore original layout with keepdim=True.
    out = out2d[0, :rows].reshape(lead)
    out = jnp.expand_dims(out, 0)
    return jnp.moveaxis(out, 0, dim)


def _reference_logvar(x, dim):
    # Pure-JAX reference mirroring torch.var(dim, keepdim=True) + clamp + log.
    var = jnp.var(x.astype(jnp.float32), axis=dim, keepdims=True, ddof=1)
    return jnp.log(jnp.clip(var, 1e-6, 1e6)).astype(x.dtype)


if __name__ == "__main__":
    key = jax.random.PRNGKey(0)
    # LogVarLayer is typically applied over the time axis of (B, C, S, T).
    B, C, S, T = 2, 4, 16, 16
    x = jax.random.normal(key, (B, C, S, T), dtype=jnp.float32)

    out = jax.block_until_ready(log_var_layer(x, 3))
    ref = _reference_logvar(x, 3)
    assert out.shape == (B, C, S, 1), out.shape
    assert jnp.allclose(out, ref, atol=1e-5, rtol=1e-5), float(
        jnp.max(jnp.abs(out - ref))
    )

    # Ragged row count (not a multiple of 128 lanes) -> exercises padded path.
    x2 = jax.random.normal(jax.random.PRNGKey(1), (3, 5, 7, 16), dtype=jnp.float32)
    out2 = jax.block_until_ready(log_var_layer(x2, 3))
    ref2 = _reference_logvar(x2, 3)
    assert out2.shape == (3, 5, 7, 1), out2.shape
    assert jnp.allclose(out2, ref2, atol=1e-5, rtol=1e-5), float(
        jnp.max(jnp.abs(out2 - ref2))
    )

    # Non-trailing reduction dim.
    out3 = jax.block_until_ready(log_var_layer(x, 2))
    ref3 = _reference_logvar(x, 2)
    assert out3.shape == (B, C, 1, T), out3.shape
    assert jnp.allclose(out3, ref3, atol=1e-5, rtol=1e-5), float(
        jnp.max(jnp.abs(out3 - ref3))
    )

    print("KERNEL_OK")
</pallas_src>

<mosaic_0001>
module attributes {stable_mosaic.version = 11 : i64} {
  func.func @_logvar_kernel(%arg0: i32, %arg1: memref<16x128xf32, #tpu.memory_space<vmem>>, %arg2: memref<1x128xf32, #tpu.memory_space<vmem>>) attributes {dimension_semantics = [#tpu.dimension_semantics<parallel>], iteration_bounds = array<i64: 1>, scalar_prefetch = 0 : i64, scratch_operands = 0 : i64, tpu.core_type = #tpu.core_type<tc>, window_params = [{transform_indices = @transform_0, window_bounds = array<i64: 16, 128>}, {transform_indices = @transform_1, window_bounds = array<i64: 1, 128>}]} {
    %c0 = arith.constant 0 : index
    %c0_0 = arith.constant 0 : index
    %0 = vector.load %arg1[%c0, %c0_0] : memref<16x128xf32, #tpu.memory_space<vmem>>, vector<16x128xf32>
    %cst = arith.constant dense<0.000000e+00> : vector<128xf32>
    %1 = vector.multi_reduction <add>, %0, %cst [0] : vector<16x128xf32> to vector<128xf32>
    %2 = vector.shape_cast %1 : vector<128xf32> to vector<1x128xf32>
    %cst_1 = arith.constant 6.250000e-02 : f32
    %3 = vector.broadcast %cst_1 : f32 to vector<1x128xf32>
    %4 = arith.mulf %2, %3 : vector<1x128xf32>
    %5 = vector.broadcast %4 : vector<1x128xf32> to vector<16x128xf32>
    %6 = arith.subf %0, %5 : vector<16x128xf32>
    %7 = arith.mulf %6, %6 : vector<16x128xf32>
    %cst_2 = arith.constant dense<0.000000e+00> : vector<128xf32>
    %8 = vector.multi_reduction <add>, %7, %cst_2 [0] : vector<16x128xf32> to vector<128xf32>
    %9 = vector.shape_cast %8 : vector<128xf32> to vector<1x128xf32>
    %cst_3 = arith.constant 0.0666666701 : f32
    %10 = vector.broadcast %cst_3 : f32 to vector<1x128xf32>
    %11 = arith.mulf %9, %10 : vector<1x128xf32>
    %cst_4 = arith.constant 9.99999997E-7 : f32
    %cst_5 = arith.constant 1.000000e+06 : f32
    %12 = vector.broadcast %cst_4 : f32 to vector<1x128xf32>
    %13 = arith.maximumf %12, %11 : vector<1x128xf32>
    %14 = vector.broadcast %cst_5 : f32 to vector<1x128xf32>
    %15 = arith.minimumf %14, %13 : vector<1x128xf32>
    %16 = math.log %15 : vector<1x128xf32>
    %c0_6 = arith.constant 0 : index
    %c0_7 = arith.constant 0 : index
    %17 = vector.load %arg2[%c0_6, %c0_7] : memref<1x128xf32, #tpu.memory_space<vmem>>, vector<1x128xf32>
    tpu.vector_store %arg2[%c0_6, %c0_7], %16 {strides = array<i32>} : memref<1x128xf32, #tpu.memory_space<vmem>>, vector<1x128xf32>,
    return
  }
  func.func @transform_0(%arg0: i32) -> (i32, i32) {
    %c0_i32 = arith.constant 0 : i32
    %c0_i32_0 = arith.constant 0 : i32
    return %c0_i32, %arg0 : i32, i32
  }
  func.func @transform_1(%arg0: i32) -> (i32, i32) {
    %c0_i32 = arith.constant 0 : i32
    %c0_i32_0 = arith.constant 0 : i32
    return %c0_i32, %arg0 : i32, i32
  }
}

</mosaic_0001>

<bundles_post_ra>
// kernel: squeeze.1
= control target key start
LH: loop header
LB: loop body
LE: loop exit
PB: predicated region body
PF: predicated region fallthrough
CT: control target
= control target key end

     0   :  { %s146_s0 = inlined_call_operand.vmem [shape: f32[128], index: 0, kind: input, shape index: {}]   ;;  %s147_s1 = inlined_call_operand.hbm [shape: f32[2,4,16,1], index: 1, kind: output, shape index: {}]  }
   0x1   :  { %v5_v0 = vld [vmem:[%s146_s0] sm:$0x1] }
   0x2   :  { %6 = vst [vmem:[#allocation3] sm:$0x1] %v5_v0 }
   0x3   :  { %2 = vsyncpa [#allocation1], 0  ;;  %s105_s0 = smov 112   ;;  %s106_s8 = smov 80   ;;  %vm8_vm0 = vcmask 130048  }
   0x4   :  { %s107_s9 = smov 96   ;;  %s108_s10 = smov 64  }
   0x5   :  { %s109_s11 = smov 48   ;;  %s110_s12 = smov 32  }
   0x6   :  { %s111_s13 = smov 16   ;;  %s112_s14 = smov [#allocation0]  }
   0x7   :  { %s67_s15 = sshll.u32 %s112_s14, 4  ;;  %s68_s15 = int_to_ptr.vmem [resolvable:$true] %s67_s15 }
   0x8   :  { %s81_s16 = scalar_lea.vmem %s68_s15, 128  ;;  %p86_p1 = scmp.lt.s32.totalorder %s68_s15, %s68_s15 }
   0x9   :  { %v10_v1 = vld [vmem:[#allocation3] sm:$0x1]   ;;  %p82_p0 = scmp.ne.s32.totalorder %s68_s15, %s81_s16  ;;  %p87_p2 = scmp.lt.s32.totalorder %s81_s16, %s81_s16 }
   0xa   :  { %v22_v2 = vld [vmem:[#allocation3] sm:$0x1]   ;;  %11 = vrot.lane.b32.xlu0 %v10_v1, %s105_s0 }
   0xb   :  { %23 = vrot.lane.b32.xlu1 %v22_v2, %s106_s8  ;;  %v16_v3 = vld [vmem:[#allocation3] sm:$0x1]   ;;  %p88_p3 = por %p87_p2, %p86_p1 }
   0xc   :  { %v28_v4 = vld [vmem:[#allocation3] sm:$0x1]  }
   0xd   :  { %v7_v5 = vld [vmem:[#allocation3] sm:$0x1]   ;;  %p89_p4 = pnand %p88_p3, %p82_p0 }
   0xe   :  { %9 = vst.msk [vmem:[#allocation2] sm:$0x1] %vm8_vm0, %v7_v5   ;;  %17 = vrot.lane.b32.xlu0 %v16_v3, %s107_s9  ;;  %v34_v6 = vld [vmem:[#allocation3] sm:$0x1]  }
   0xf   :  { %29 = vrot.lane.b32.xlu1 %v28_v4, %s108_s10  ;;  %v40_v7 = vld [vmem:[#allocation3] sm:$0x1]  }
  0x10   :  { %v46_v8 = vld [vmem:[#allocation3] sm:$0x1]  }
  0x12   :  { %35 = vrot.lane.b32.xlu0 %v34_v6, %s109_s11 }
  0x13   :  { %41 = vrot.lane.b32.xlu1 %v40_v7, %s110_s12 }
  0x16   :  { %47 = vrot.lane.b32.xlu0 %v46_v8, %s111_s13 }
  0x7c   :  { %v12_v9 = vpop.permute.xlu0 %11  }
  0x7d   :  { %v24_v10 = vpop.permute.xlu1 %23   ;;  %15 = vst.msk [vmem:[#allocation2 + $0x1] sm:$0x1] %vm8_vm0, %v12_v9  }
  0x7e   :  { %27 = vst.msk [vmem:[#allocation2 + $0x3] sm:$0x1] %vm8_vm0, %v24_v10  }
  0x80   :  { %v18_v11 = vpop.permute.xlu0 %17  }
  0x81   :  { %v30_v12 = vpop.permute.xlu1 %29   ;;  %21 = vst.msk [vmem:[#allocation2 + $0x2] sm:$0x1] %vm8_vm0, %v18_v11  }
  0x82   :  { %33 = vst.msk [vmem:[#allocation2 + $0x8] sm:$0x1] %vm8_vm0, %v30_v12  }
  0x84   :  { %v36_v13 = vpop.permute.xlu0 %35  }
  0x85   :  { %v42_v14 = vpop.permute.xlu1 %41   ;;  %39 = vst.msk [vmem:[#allocation2 + $0x9] sm:$0x1] %vm8_vm0, %v36_v13  }
  0x86   :  { %45 = vst.msk [vmem:[#allocation2 + $0xa] sm:$0x1] %vm8_vm0, %v42_v14  }
  0x88   :  { %v48_v15 = vpop.permute.xlu0 %47   ;;  %v55_v16 = vld [vmem:[#allocation2] sm:$0xf] }
  0x89   :  { %51 = vst.msk [vmem:[#allocation2 + $0xb] sm:$0x1] %vm8_vm0, %v48_v15   ;;  %57 = vst [vmem:[#allocation0] sm:$0xf] %v55_v16 }
  0x90   :  { %v59_v17 = vld [vmem:[#allocation2 + $0x8] sm:$0xf] }
  0x91   :  { %62 = vst [vmem:[#allocation0 + $0x4] sm:$0xf] %v59_v17 }
  0x92   :  { %92 = shalt.err (!%p89_p4)
}
  0x93   :  { %s93_s19 = scalar_lea.hbm %s147_s1, 128 }
  0x94   :  { %p94_p5 = scmp.ne.s32.totalorder %s147_s1, %s93_s19  ;;  %p97_p6 = scmp.lt.u32.totalorder %s93_s19, %s147_s1 }
  0x96   :  { %p99_p7 = pnand %p97_p6, %p94_p5 }
  0x98   :  { %102 = shalt.err (!%p99_p7)
}
  0x99   :  { %70 = dma.vmem_to_hbm [thread:$0]  %s68_s15, 128, %s147_s1, [#allocation1]  }
  0x9a   :  { %103 = dma.done.wait [#allocation1], 128  }
  0x9b   :  { %104 = vsyncadd [#allocation1], 4294967168 }
  0x9c   :  { %72 = vsyncpa [#allocation1], 1 }

</bundles_post_ra>
